<compile_context>
chip_gen: v5e
topology: v5e:2x2
jax: 0.10.0
libtpu: 0.0.40
codegen_flags: <defaults>
</compile_context>

<pallas_src>
import functools

import jax
import jax.numpy as jnp
from jax import lax
from jax.experimental import pallas as pl
from jax.experimental.pallas import tpu as pltpu


def _make_pos_enc(max_len: int, embed_dim: int) -> jnp.ndarray:
    """Deterministic sinusoidal table, matches the PyTorch __init__ exactly."""
    assert embed_dim % 2 == 0
    positions = jnp.arange(max_len, dtype=jnp.float32)                        # (L,)
    ang_freq = jnp.power(
        10000.0, (-1.0 / embed_dim) * jnp.arange(embed_dim // 2, dtype=jnp.float32)
    )                                                                          # (D/2,)
    angles = jnp.outer(positions, ang_freq)                                    # (L, D/2)
    pos_enc = jnp.concatenate((jnp.cos(angles), jnp.sin(angles)), axis=1)      # (L, D)
    return pos_enc[None, :, :]                                                 # (1, L, D)


def _pos_enc_kernel(seed_ref, x_ref, pe_ref, o_ref, *,
                    dropout_prob: float, training: bool, total_rows: int):
    # x_ref / pe_ref / o_ref: (TILE_R, LANE) VMEM tiles (batch dim squeezed).
    y = x_ref[...] + pe_ref[...]

    if training and dropout_prob >= 1.0:
        # PyTorch Dropout(p=1) zeroes everything.
        y = jnp.zeros_like(y)
    elif training and dropout_prob > 0.0:
        tile_r, lane = y.shape
        r_tile = pl.program_id(0)   # row-tile index
        b = pl.program_id(1)        # batch index

        # Global flattened element index (int32, wraps for huge tensors; fine
        # for dropout).  Matches the canonical (b, s, d) flattening.
        row = lax.broadcasted_iota(jnp.int32, y.shape, 0)
        col = lax.broadcasted_iota(jnp.int32, y.shape, 1)
        g_row = r_tile * tile_r + row
        elem = (b * total_rows + g_row) * lane + col

        # Counter-based PRNG: lowbias32-style mixer, int32 with wraparound.
        # Logical right shifts emulated as arithmetic shift + mask.
        seed = seed_ref[0]
        h = elem ^ (seed * jnp.int32(-1640531527))          # 0x9E3779B9
        h = h ^ ((h >> 16) & jnp.int32(0xFFFF))
        h = h * jnp.int32(0x7FEB352D)
        h = h ^ ((h >> 15) & jnp.int32(0x1FFFF))
        h = h * jnp.int32(-2073468277)                      # 0x846CA68B
        h = h ^ ((h >> 16) & jnp.int32(0xFFFF))

        # h is ~uniform over all int32 values.  Keep with prob (1 - p):
        # P(h >= p*2^32 - 2^31) = 1 - p.
        thresh = min(int(round(dropout_prob * 2.0 ** 32)), 2 ** 32 - 1) - 2 ** 31
        keep = h >= jnp.int32(thresh)

        scale = 1.0 / (1.0 - dropout_prob)
        y = jnp.where(keep, y * scale, jnp.zeros_like(y))

    o_ref[...] = y.astype(o_ref.dtype)


def positional_encoding(
    x: jnp.ndarray,
    pos_enc: jnp.ndarray,
    *,
    dropout_prob: float,
    training: bool,
    seed: int = 0,
) -> jnp.ndarray:
    """x: (B, S, D); pos_enc: (1, max_len, D)."""
    B, S, D = x.shape
    assert pos_enc.shape[0] == 1 and pos_enc.shape[2] == D
    assert S <= pos_enc.shape[1]

    # Glue: slice table, match x's dtype (bf16-native compute on v6e/v7x).
    pe = pos_enc[:, :S, :].astype(x.dtype)                  # (1, S, D)

    # Lane-dense layout: fold (S, D) into rows of 128 lanes when possible so
    # stores are full-width; otherwise fall back to (S, D) rows.
    n_elem = S * D
    if n_elem % 128 == 0:
        lane = 128
        rows = n_elem // 128
    else:
        lane = D
        rows = S
    x_r = x.reshape(B, rows, lane)
    pe_r = pe.reshape(1, rows, lane)

    # Row tiling: full extent if small, otherwise 512 rows (multiple of 8),
    # keeping every double-buffered block well inside scoped VMEM on all gens.
    max_tile = 512
    tile_r = rows if rows <= max_tile else max_tile
    num_r = pl.cdiv(rows, tile_r)

    seed_arr = jnp.array([seed], dtype=jnp.int32)

    kernel = functools.partial(
        _pos_enc_kernel,
        dropout_prob=float(dropout_prob),
        training=bool(training),
        total_rows=rows,
    )

    out = pl.pallas_call(
        kernel,
        out_shape=jax.ShapeDtypeStruct((B, rows, lane), x.dtype),
        grid_spec=pltpu.PrefetchScalarGridSpec(
            num_scalar_prefetch=1,
            # batch innermost: pe's block index is constant across it -> no re-DMA.
            grid=(num_r, B),
            in_specs=[
                pl.BlockSpec((None, tile_r, lane), lambda r, b, seed: (b, r, 0)),  # x
                pl.BlockSpec((None, tile_r, lane), lambda r, b, seed: (0, r, 0)),  # pe
            ],
            out_specs=pl.BlockSpec((None, tile_r, lane), lambda r, b, seed: (b, r, 0)),
        ),
        compiler_params=pltpu.CompilerParams(
            dimension_semantics=("parallel", "parallel"),
        ),
    )(seed_arr, x_r, pe_r)

    return out.reshape(B, S, D)


if __name__ == "__main__":
    # Module config (small, consistent with the forward's expectations).
    max_len = 16
    embed_dim = 32
    dropout_prob = 0.1

    # Example input: batch=2, seq=8, embed=32.
    B, S, D = 2, 8, embed_dim
    key = jax.random.PRNGKey(0)
    x = jax.random.normal(key, (B, S, D), dtype=jnp.float32)

    pos_enc = _make_pos_enc(max_len, embed_dim)
    ref = x + pos_enc[:, :S, :]

    # Eval-mode forward (dropout is identity) -- verify against pure-JAX ref.
    y_eval = positional_encoding(x, pos_enc, dropout_prob=dropout_prob, training=False)
    y_eval = jax.block_until_ready(y_eval)
    assert y_eval.shape == (B, S, D)
    assert jnp.allclose(y_eval, ref, atol=1e-5, rtol=1e-5), "mismatch vs reference"

    # Training-mode forward (in-kernel deterministic dropout).
    y_train = positional_encoding(
        x, pos_enc, dropout_prob=dropout_prob, training=True, seed=1234
    )
    y_train = jax.block_until_ready(y_train)
    assert y_train.shape == (B, S, D)
    # Every element is either dropped (0) or the kept value scaled by 1/(1-p).
    scaled = ref / (1.0 - dropout_prob)
    is_drop = jnp.abs(y_train) < 1e-12
    is_keep = jnp.abs(y_train - scaled) < 1e-4
    assert bool(jnp.all(is_drop | is_keep)), "dropout output is not {0, scaled} valued"

    print("KERNEL_OK")
</pallas_src>

<mosaic_0001>
module attributes {stable_mosaic.version = 11 : i64} {
  func.func @_pos_enc_kernel(%arg0: i32, %arg1: i32, %arg2: memref<1xi32, #tpu.memory_space<smem>>, %arg3: memref<1x2x128xf32, #tpu.memory_space<vmem>>, %arg4: memref<1x2x128xf32, #tpu.memory_space<vmem>>, %arg5: memref<1x2x128xf32, #tpu.memory_space<vmem>>) attributes {dimension_semantics = [#tpu.dimension_semantics<parallel>, #tpu.dimension_semantics<parallel>], iteration_bounds = array<i64: 1, 2>, scalar_prefetch = 1 : i64, scratch_operands = 0 : i64, tpu.core_type = #tpu.core_type<tc>, window_params = [{transform_indices = @transform_0, window_bounds = array<i64: 1, 2, 128>}, {transform_indices = @transform_1, window_bounds = array<i64: 1, 2, 128>}, {transform_indices = @transform_2, window_bounds = array<i64: 1, 2, 128>}]} {
    %c0 = arith.constant 0 : index
    %c0_0 = arith.constant 0 : index
    %c0_1 = arith.constant 0 : index
    %0 = vector.load %arg3[%c0, %c0_0, %c0_1] : memref<1x2x128xf32, #tpu.memory_space<vmem>>, vector<1x2x128xf32>
    %1 = vector.shape_cast %0 : vector<1x2x128xf32> to vector<2x128xf32>
    %c0_2 = arith.constant 0 : index
    %c0_3 = arith.constant 0 : index
    %c0_4 = arith.constant 0 : index
    %2 = vector.load %arg4[%c0_2, %c0_3, %c0_4] : memref<1x2x128xf32, #tpu.memory_space<vmem>>, vector<1x2x128xf32>
    %3 = vector.shape_cast %2 : vector<1x2x128xf32> to vector<2x128xf32>
    %4 = arith.addf %1, %3 : vector<2x128xf32>
    %c0_5 = arith.constant 0 : index
    %c0_6 = arith.constant 0 : index
    %c0_7 = arith.constant 0 : index
    %5 = vector.load %arg5[%c0_5, %c0_6, %c0_7] : memref<1x2x128xf32, #tpu.memory_space<vmem>>, vector<1x2x128xf32>
    %6 = vector.shape_cast %5 : vector<1x2x128xf32> to vector<2x128xf32>
    %7 = vector.shape_cast %4 : vector<2x128xf32> to vector<1x2x128xf32>
    tpu.vector_store %arg5[%c0_5, %c0_6, %c0_7], %7 {strides = array<i32>} : memref<1x2x128xf32, #tpu.memory_space<vmem>>, vector<1x2x128xf32>,
    return
  }
  func.func @transform_0(%arg0: i32, %arg1: i32, %arg2: memref<1xi32, #tpu.memory_space<smem>>) -> (i32, i32, i32) {
    %c0_i32 = arith.constant 0 : i32
    %c0_i32_0 = arith.constant 0 : i32
    return %arg1, %arg0, %c0_i32 : i32, i32, i32
  }
  func.func @transform_1(%arg0: i32, %arg1: i32, %arg2: memref<1xi32, #tpu.memory_space<smem>>) -> (i32, i32, i32) {
    %c0_i32 = arith.constant 0 : i32
    %c0_i32_0 = arith.constant 0 : i32
    %c0_i32_1 = arith.constant 0 : i32
    return %c0_i32, %arg0, %c0_i32_0 : i32, i32, i32
  }
  func.func @transform_2(%arg0: i32, %arg1: i32, %arg2: memref<1xi32, #tpu.memory_space<smem>>) -> (i32, i32, i32) {
    %c0_i32 = arith.constant 0 : i32
    %c0_i32_0 = arith.constant 0 : i32
    return %arg1, %arg0, %c0_i32 : i32, i32, i32
  }
}

</mosaic_0001>

<bundles_post_ra>
// kernel: tpu_custom_call.1
= control target key start
LH: loop header
LB: loop body
LE: loop exit
PB: predicated region body
PF: predicated region fallthrough
CT: control target
= control target key end

     0   :  { %9 = vsyncpa [#allocation5], 0  ;;  %s646_s0 = inlined_call_operand.<no memory space> [shape: s32[1], index: 0, kind: input, shape index: {}]   ;;  %s647_s1 = inlined_call_operand.hbm [shape: f32[2,2,128], index: 1, kind: input, shape index: {}]   ;;  %s648_s2 = inlined_call_operand.vmem [shape: f32[1,2,128], index: 2, kind: input, shape index: {}]   ;;  %s649_s3 = inlined_call_operand.hbm [shape: f32[2,2,128], index: 3, kind: output, shape index: {}]  }
   0x1   :  { %11 = vsyncpa [#allocation5 + $0x1], 0 }
   0x2   :  { %12 = vsyncpa [#allocation6], 0 }
   0x3   :  { %14 = vsyncpa [#allocation6 + $0x1], 0  ;;  %s523_s12 = smov 0   ;;  %s525_s13 = smov 0  }
   0x4   :  { %s527_s14 = smov 0   ;;  %s529_s0 = smov 0  }
   0x5   :  { %s531_s15 = smov 0   ;;  %s533_s16 = smov 0  }
   0x6 LB: > { %s313_s17 = sadd.s32 4294967295, %s501_s16   ;;  %s314_s18 = sadd.s32 4294967294, %s501_s16   ;;  %s501_s16 = sphi %s533_s16, %s20_s16   ;;  %s497_s15 = sphi %s531_s15, %s658_s15   ;;  %s493_s0 = sphi %s529_s0, %s657_s0   ;;  %s489_s14 = sphi %s527_s14, %s656_s14   ;;  %s485_s13 = sphi %s525_s13, %s655_s13   ;;  %s481_s12 = sphi %s523_s12, %s654_s12  }
   0x7   : > { %s29_s19 = sadd.s32 1, %s497_s15  ;;  %s41_s20 = sadd.s32 1, %s489_s14 }
   0x8   : > { %p30_p0 = scmp.ge.s32.totalorder %s29_s19, 2  ;;  %p48_p1 = scmp.ne.s32.totalorder %s489_s14, %s485_s13 }
   0x9   : > { %p49_p2 = scmp.eq.s32.totalorder %s501_s16, 0  ;;  %p54_p3 = scmp.ne.s32.totalorder %s485_s13, %s481_s12 }
   0xa   : > { %s660_s19 = smov (%p30_p0, %s29_s19), 0  ;;  %p55_p5 = scmp.eq.s32.totalorder %s313_s17, 0 }
   0xb   : > { %p564_p4 = por %p49_p2, %p48_p1  ;;  %s36_s22 = ssub.s32 %s497_s15, %s660_s19 }
   0xc   : > { %p106_p6 = scmp.eq.s32.totalorder %s313_s17, 1  ;;  %p39_p7 = scmp.eq.s32.totalorder %s36_s22, 0 }
   0xd   : > { %p570_p8 = por %p55_p5, %p54_p3  ;;  %p112_p10 = scmp.eq.s32.totalorder %s314_s18, 1 }
   0xe   : > { %p574_p9 = por %p106_p6, %p48_p1  ;;  %p317_p12 = scmp.ge.s32.totalorder %s501_s16, 2 }
   0xf   : > { %s579_s25 = scalar_select %p39_p7, %s489_s14, %s41_s20  }
  0x10   : > { %p581_p11 = por %p112_p10, %p54_p3  ;;  %p339_p13 = scmp.lt.s32.totalorder %s501_s16, 2 }
  0x11   : > { %s139_s27 = sand.u32 1, %s489_s14   ;;  %s319_s29 = sshll.u32 %s497_s15, 1 }
  0x12   : > { %s318_s28 = sshll.u32 %s139_s27, 1  ;;  %s148_s5 = scalar_lea.hbm %s647_s1, %s319_s29 }
  0x13   : > { %s143_s6 = scalar_lea.vmem [#allocation4], %s318_s28  ;;  %s150_s8 = sshll.u32 %s148_s5, 4  ;;  %s151_s8 = int_to_ptr.hbm [resolvable:$true] %s150_s8 }
  0x14   : > { %s152_s7 = sshll.u32 %s143_s6, 4  ;;  %p332_p0 = pnand %p339_p13, %p564_p4  ;;  %s153_s7 = int_to_ptr.vmem [resolvable:$true] %s152_s7 }
  0x15   : > { %p320_p1 = scmp.ge.s32.totalorder %s501_s16, 1  ;;  %p157_p2 = scmp.lt.s32.totalorder %s501_s16, 3 }
  0x16   : > { %s140_s9 = scalar_lea.sflag [#allocation5], %s139_s27 }
  0x17   : > { %334 = dma.hbm_to_vmem [thread:$0]  (!%p332_p0), %s151_s8, 32, %s153_s7, %s140_s9  }
  0x18   : > { %p158_p3 = pnand %p320_p1, %p157_p2 }
  0x19   : > { %s597_s10 = sand.u32 (!%p158_p3), 1, %s485_s13  }
  0x1a   : > { %161 = sbr.rel (%p158_p3) target bundleno = 47 (0x2f), region = 28  ;;  %s321_s11 = sshll.u32 (!%p158_p3), %s597_s10, 1 }
  0x1b   : > { %s164_s17 = scalar_lea.sflag (!%p158_p3), [#allocation5], %s597_s10  ;;  %s167_s18 = scalar_lea.vmem (!%p158_p3), [#allocation4], %s321_s11 }
  0x1f   : > { %472 = dma.done.wait (%p570_p8), %s164_s17, 32  }
  0x20   : > { %474 = vsyncadd (%p570_p8), %s164_s17, 4294967264  ;;  %s324_s20 = sshll.u32 %s493_s0, 1  ;;  %s192_s28 = scalar_lea.vmem [#allocation7], %s321_s11  ;;  %v197_v0 = vld [vmem:[%s167_s18] sm:$0x3] }
  0x21   : > { %s213_s27 = scalar_lea.hbm %s649_s3, %s324_s20  ;;  %s215_s29 = sshll.u32 %s192_s28, 4  ;;  %v198_v1 = vld [vmem:[%s648_s2] sm:$0x3]  ;;  %s216_s29 = int_to_ptr.vmem [resolvable:$true] %s215_s29 }
  0x22   : > { %s217_s30 = sshll.u32 %s213_s27, 4  ;;  %v199_v2 = vadd.f32 %v198_v1, %v197_v0  ;;  %s202_s23 = scalar_lea.sflag [#allocation6], %s597_s10  ;;  %s218_s30 = int_to_ptr.hbm [resolvable:$true] %s217_s30 }
  0x23   : > { %s433_s6 = sshra.s32 %s218_s30, 4  ;;  %s439_s9 = scalar_lea.hbm %s649_s3, 4  ;;  %s434_s6 = int_to_ptr.hbm [resolvable:$true] %s433_s6 }
  0x24   : > { %200 = vst [vmem:[%s192_s28] sm:$0x3] %v199_v2  ;;  %s435_s0 = scalar_lea.hbm %s434_s6, 2  ;;  %p440_p7 = scmp.lt.s32.totalorder %s434_s6, %s649_s3 }
  0x25   : > { %p436_p4 = scmp.ne.s32.totalorder %s434_s6, %s435_s0  ;;  %p441_p8 = scmp.lt.s32.totalorder %s439_s9, %s435_s0 }
  0x27   : > { %p437_p5 = pnand %p436_p4, %p574_p9  ;;  %p442_p10 = por %p441_p8, %p440_p7 }
  0x29   : > { %p438_p6 = pneg %p437_p5 }
  0x2b   : > { %p443_p13 = pnand %p442_p10, %p438_p6 }
  0x2d   : > { %446 = shalt.err (!%p443_p13)
}
  0x2e   : > { %329 = dma.vmem_to_hbm [thread:$0]  (%p574_p9), %s216_s29, 32, %s218_s30, %s202_s23  }
  0x2f PF: > { %s229_s10 = sand.u32 1, %s481_s12   ;;  %p336_p0 = pnand %p317_p12, %p581_p11 }
  0x30   : > { %s230_s18 = scalar_lea.sflag [#allocation6], %s229_s10 }
  0x31   : > { %p337_p1 = pneg %p336_p0 }
  0x33   : > { %476 = dma.done.wait (%p337_p1), %s230_s18, 32  }
  0x34   : > { %478 = vsyncadd (%p337_p1), %s230_s18, 4294967264  ;;  %s20_s16 = sadd.s32 1, %s501_s16   ;;  %s654_s12 = smov %s485_s13 }
  0x35   : > { %p17_p2 = scmp.ge.s32.totalorder %s20_s16, 4   ;;  %s655_s13 = smov %s489_s14 }
  0x36   : > { %s656_s14 = smov %s579_s25  ;;  %s657_s0 = smov %s497_s15 }
  0x37   : > { %s658_s15 = smov %s660_s19  ;;  %19 = sbr.rel (!%p17_p2) target bundleno = 6 (0x6), region = 76 }
  0x3c   :  { %236 = vsyncpa [#allocation5], 1 }
  0x3d   :  { %238 = vsyncpa [#allocation5 + $0x1], 1 }
  0x3e   :  { %239 = vsyncpa [#allocation6], 1 }
  0x3f   :  { %241 = vsyncpa [#allocation6 + $0x1], 1 }

</bundles_post_ra>
